<compile_context>
chip_gen: v5e
topology: v5e:2x2
jax: 0.10.0
libtpu: 0.0.40
codegen_flags: <defaults>
</compile_context>

<pallas_src>
import jax
import jax.numpy as jnp
from jax.experimental import pallas as pl
from jax.experimental.pallas import tpu as pltpu


_TARGET_BLOCK_BYTES = 4 * 1024 * 1024   # ~4 MiB writeback blocks (copy-roofline knee)
_SMALL_TOTAL_BYTES = 4 * 1024 * 1024    # below this, emit the whole output in one step
_VMEM_FLOOR_BYTES = 32 * 1024 * 1024    # raise above v5e's 16 MiB scoped default
_VMEM_CEIL_BYTES = 48 * 1024 * 1024     # stay safely under v7x's 64 MiB physical VMEM


def _repeat_kernel(emb_ref, out_ref):
    # out_ref: (reps, n_tokens, hidden); emb_ref: (n_tokens, hidden).
    # Single broadcast + one lane-dense unmasked store slab per grid step.
    reps = out_ref.shape[0]
    out_ref[...] = jnp.broadcast_to(emb_ref[...][None], (reps,) + emb_ref.shape)


def _pick_replicas_per_block(batch: int, bytes_per_replica: int, total_bytes: int) -> int:
    """How many batch replicas each grid step writes (must divide batch)."""
    if batch == 1 or total_bytes <= _SMALL_TOTAL_BYTES:
        # Tiny output: single grid step, zero per-step overhead.
        return batch
    # Largest divisor of batch such that the output block stays <= ~4 MiB and
    # at least 2 grid steps remain (v7x megacore sharding over the batch axis).
    best = 1
    for r in range(1, batch // 2 + 1):
        if batch % r == 0 and r * bytes_per_replica <= _TARGET_BLOCK_BYTES:
            best = r
    return best


def soft_embedding_forward(learned_embedding: jax.Array, input_ids: jax.Array) -> jax.Array:
    """Pallas implementation of SoftEmbedding.forward.

    learned_embedding: (n_tokens, hidden) float32
    input_ids:         (B, ...) — only B (shape[0]) is used, matching PyTorch.
    returns:           (B * n_tokens, hidden) float32
    """
    n_tokens, hidden = learned_embedding.shape
    batch = input_ids.shape[0]
    dtype = learned_embedding.dtype
    itemsize = jnp.dtype(dtype).itemsize
    bytes_per_replica = n_tokens * hidden * itemsize
    total_bytes = batch * bytes_per_replica

    reps = _pick_replicas_per_block(batch, bytes_per_replica, total_bytes)
    num_steps = batch // reps
    block_bytes = reps * bytes_per_replica

    # Output buffering depth: deeper buffering only pays off on the multi-step
    # (pipelined) path; drop back to the default of 2 if 3 buffers would not
    # fit in the scoped-VMEM budget (e.g. a single huge replica when reps==1).
    out_buffers = 3 if num_steps >= 3 else 2
    slack = 1 << 20  # input double-buffer (tiny) + compiler scratch headroom
    if out_buffers * block_bytes + 2 * bytes_per_replica + slack > _VMEM_CEIL_BYTES:
        out_buffers = 2
    vmem_needed = out_buffers * block_bytes + 2 * bytes_per_replica + slack
    vmem_limit = int(min(max(_VMEM_FLOOR_BYTES, vmem_needed), _VMEM_CEIL_BYTES))

    out_spec_kwargs = {"pipeline_mode": pl.Buffered(out_buffers)} if out_buffers != 2 else {}

    out3 = pl.pallas_call(
        _repeat_kernel,
        out_shape=jax.ShapeDtypeStruct((batch, n_tokens, hidden), dtype),
        grid_spec=pltpu.PrefetchScalarGridSpec(
            num_scalar_prefetch=0,
            grid=(num_steps,),
            in_specs=[
                # Constant block index -> Pallas keeps the embedding resident
                # in VMEM and does not re-DMA it after step 0.
                pl.BlockSpec((n_tokens, hidden), lambda b: (0, 0)),
            ],
            out_specs=pl.BlockSpec(
                (reps, n_tokens, hidden),
                lambda b: (b, 0, 0),
                **out_spec_kwargs,
            ),
        ),
        compiler_params=pltpu.CompilerParams(
            dimension_semantics=("parallel",),
            vmem_limit_bytes=vmem_limit,
        ),
    )(learned_embedding)

    # Row-major contiguous reshape: (B, n_tokens, H) -> (B*n_tokens, H) is free.
    return out3.reshape(batch * n_tokens, hidden)


if __name__ == "__main__":
    key = jax.random.PRNGKey(0)
    k_emb, k_ids = jax.random.split(key)

    # Module config: args.num_token -> n_tokens; hidden is fixed at 4096 by the module.
    n_tokens = 8
    hidden = 4096
    batch = 2
    seq = 8

    # Deterministic parameter init matching t.FloatTensor(...).uniform_(-0.5, 0.5)
    learned_embedding = jax.random.uniform(
        k_emb, (n_tokens, hidden), dtype=jnp.float32, minval=-0.5, maxval=0.5
    )

    # input_ids: only shape[0] matters, values unused (as in the PyTorch module).
    input_ids = jax.random.randint(k_ids, (batch, seq), 0, 100, dtype=jnp.int32)

    # --- Small (demo) config: exercises the single-step fast path. ---
    out = soft_embedding_forward(learned_embedding, input_ids)
    out = jax.block_until_ready(out)
    ref = jnp.tile(learned_embedding, (batch, 1))
    assert out.shape == (batch * n_tokens, hidden), out.shape
    assert out.dtype == jnp.float32
    assert jnp.array_equal(out, ref), "mismatch vs reference tile (small path)"

    # --- Larger batch: exercises the fused multi-step pipelined path. ---
    big_batch = 96  # 96 * 8 * 4096 * 4B = 12 MiB output -> 3 grid steps of 4 MiB
    big_ids = jnp.zeros((big_batch, seq), dtype=jnp.int32)
    out_big = soft_embedding_forward(learned_embedding, big_ids)
    out_big = jax.block_until_ready(out_big)
    ref_big = jnp.tile(learned_embedding, (big_batch, 1))
    assert out_big.shape == (big_batch * n_tokens, hidden), out_big.shape
    assert jnp.array_equal(out_big, ref_big), "mismatch vs reference tile (fused path)"

    print("KERNEL_OK")
</pallas_src>

<mosaic_0001>
module attributes {stable_mosaic.version = 11 : i64} {
  func.func @_repeat_kernel(%arg0: i32, %arg1: memref<8x4096xf32, #tpu.memory_space<vmem>>, %arg2: memref<2x8x4096xf32, #tpu.memory_space<vmem>>) attributes {dimension_semantics = [#tpu.dimension_semantics<parallel>], iteration_bounds = array<i64: 1>, scalar_prefetch = 0 : i64, scratch_operands = 0 : i64, tpu.core_type = #tpu.core_type<tc>, window_params = [{pipeline_mode = #tpu.pipeline_mode<synchronous>, transform_indices = @transform_0, window_bounds = array<i64: 8, 4096>}, {transform_indices = @transform_1, window_bounds = array<i64: 2, 8, 4096>}]} {
    %c0 = arith.constant 0 : index
    %c0_0 = arith.constant 0 : index
    %0 = vector.load %arg1[%c0, %c0_0] : memref<8x4096xf32, #tpu.memory_space<vmem>>, vector<8x4096xf32>
    %1 = vector.shape_cast %0 : vector<8x4096xf32> to vector<1x8x4096xf32>
    %2 = vector.shape_cast %1 : vector<1x8x4096xf32> to vector<1x8x4096xf32>
    %3 = vector.broadcast %2 : vector<1x8x4096xf32> to vector<2x8x4096xf32>
    %c0_1 = arith.constant 0 : index
    %c0_2 = arith.constant 0 : index
    %c0_3 = arith.constant 0 : index
    %4 = vector.load %arg2[%c0_1, %c0_2, %c0_3] : memref<2x8x4096xf32, #tpu.memory_space<vmem>>, vector<2x8x4096xf32>
    tpu.vector_store %arg2[%c0_1, %c0_2, %c0_3], %3 {strides = array<i32>} : memref<2x8x4096xf32, #tpu.memory_space<vmem>>, vector<2x8x4096xf32>,
    return
  }
  func.func @transform_0(%arg0: i32) -> (i32, i32) {
    %c0_i32 = arith.constant 0 : i32
    %c0_i32_0 = arith.constant 0 : i32
    %c0_i32_1 = arith.constant 0 : i32
    return %c0_i32, %c0_i32_0 : i32, i32
  }
  func.func @transform_1(%arg0: i32) -> (i32, i32, i32) {
    %c0_i32 = arith.constant 0 : i32
    %c0_i32_0 = arith.constant 0 : i32
    %c0_i32_1 = arith.constant 0 : i32
    return %arg0, %c0_i32, %c0_i32_0 : i32, i32, i32
  }
}

</mosaic_0001>

<bundles_post_ra>
// kernel: tpu_custom_call.1
= control target key start
LH: loop header
LB: loop body
LE: loop exit
PB: predicated region body
PF: predicated region fallthrough
CT: control target
= control target key end

     0   :  { %6 = vsyncpa [#allocation3], 0  ;;  %s214_s0 = inlined_call_operand.hbm [shape: f32[8,4096], index: 0, kind: input, shape index: {}]   ;;  %s215_s1 = inlined_call_operand.hbm [shape: f32[2,8,4096], index: 1, kind: output, shape index: {}]  }
   0x1   :  { %7 = vsyncpa [#allocation4], 0  ;;  %s13_s8 = sshll.u32 %s214_s0, 4  ;;  %s194_s9 = smov [#allocation2]   ;;  %s14_s8 = int_to_ptr.hbm [resolvable:$true] %s13_s8 }
   0x2   :  { %s15_s10 = sshll.u32 %s194_s9, 4  ;;  %s16_s10 = int_to_ptr.vmem [resolvable:$true] %s15_s10 }
   0x3   :  { %18 = dma.hbm_to_vmem [thread:$0]  %s14_s8, 4096, %s16_s10, [#allocation3]  }
   0x4   :  { %190 = dma.done.wait [#allocation3], 4096  }
   0x5   :  { %191 = vsyncadd [#allocation3], 4294963200  ;;  %v23_v0 = vld [vmem:[#allocation2] sm:$0xff]  ;;  %v24_v1 = vld [vmem:[#allocation2 + $0x8] sm:$0xff]  ;;  %s195_s0 = smov [#allocation5]   ;;  %s125_s14 = sshll.u32 %s215_s1, 4  ;;  %s126_s14 = int_to_ptr.hbm [resolvable:$true] %s125_s14 }
   0x6   :  { %55 = vst [vmem:[#allocation5] sm:$0xff] %v23_v0  ;;  %v25_v2 = vld [vmem:[#allocation2 + $0x10] sm:$0xff]  ;;  %v26_v3 = vld [vmem:[#allocation2 + $0x18] sm:$0xff]  ;;  %v27_v4 = vld [vmem:[#allocation2 + $0x20] sm:$0xff]  ;;  %s123_s11 = sshll.u32 %s195_s0, 4  ;;  %s196_s15 = smov 4096   ;;  %s124_s11 = int_to_ptr.vmem [resolvable:$true] %s123_s11 }
   0x7   :  { %87 = vst [vmem:[#allocation5 + $0x100] sm:$0xff] %v23_v0  ;;  %v28_v5 = vld [vmem:[#allocation2 + $0x28] sm:$0xff]  ;;  %v29_v6 = vld [vmem:[#allocation2 + $0x30] sm:$0xff]  ;;  %v30_v7 = vld [vmem:[#allocation2 + $0x38] sm:$0xff]  ;;  %s197_s16 = smov 256  }
   0x8   :  { %56 = vst [vmem:[#allocation5 + $0x8] sm:$0xff] %v24_v1  ;;  %v31_v8 = vld [vmem:[#allocation2 + $0x40] sm:$0xff]  ;;  %v32_v9 = vld [vmem:[#allocation2 + $0x48] sm:$0xff]  ;;  %v33_v10 = vld [vmem:[#allocation2 + $0x50] sm:$0xff] }
   0x9   :  { %88 = vst [vmem:[#allocation5 + $0x108] sm:$0xff] %v24_v1  ;;  %v34_v11 = vld [vmem:[#allocation2 + $0x58] sm:$0xff]  ;;  %v35_v12 = vld [vmem:[#allocation2 + $0x60] sm:$0xff]  ;;  %v36_v13 = vld [vmem:[#allocation2 + $0x68] sm:$0xff] }
   0xa   :  { %57 = vst [vmem:[#allocation5 + $0x10] sm:$0xff] %v25_v2  ;;  %v37_v14 = vld [vmem:[#allocation2 + $0x70] sm:$0xff]  ;;  %v38_v15 = vld [vmem:[#allocation2 + $0x78] sm:$0xff]  ;;  %v39_v16 = vld [vmem:[#allocation2 + $0x80] sm:$0xff] }
   0xb   :  { %89 = vst [vmem:[#allocation5 + $0x110] sm:$0xff] %v25_v2  ;;  %v40_v17 = vld [vmem:[#allocation2 + $0x88] sm:$0xff]  ;;  %v41_v18 = vld [vmem:[#allocation2 + $0x90] sm:$0xff]  ;;  %v42_v19 = vld [vmem:[#allocation2 + $0x98] sm:$0xff] }
   0xc   :  { %58 = vst [vmem:[#allocation5 + $0x18] sm:$0xff] %v26_v3  ;;  %v43_v20 = vld [vmem:[#allocation2 + $0xa0] sm:$0xff]  ;;  %v44_v21 = vld [vmem:[#allocation2 + $0xa8] sm:$0xff]  ;;  %v45_v22 = vld [vmem:[#allocation2 + $0xb0] sm:$0xff] }
   0xd   :  { %90 = vst [vmem:[#allocation5 + $0x118] sm:$0xff] %v26_v3  ;;  %v46_v23 = vld [vmem:[#allocation2 + $0xb8] sm:$0xff]  ;;  %v47_v24 = vld [vmem:[#allocation2 + $0xc0] sm:$0xff]  ;;  %v48_v25 = vld [vmem:[#allocation2 + $0xc8] sm:$0xff] }
   0xe   :  { %59 = vst [vmem:[#allocation5 + $0x20] sm:$0xff] %v27_v4  ;;  %v49_v26 = vld [vmem:[#allocation2 + $0xd0] sm:$0xff]  ;;  %v50_v27 = vld [vmem:[#allocation2 + $0xd8] sm:$0xff]  ;;  %v51_v28 = vld [vmem:[#allocation2 + $0xe0] sm:$0xff] }
   0xf   :  { %91 = vst [vmem:[#allocation5 + $0x120] sm:$0xff] %v27_v4  ;;  %v52_v29 = vld [vmem:[#allocation2 + $0xe8] sm:$0xff]  ;;  %v53_v30 = vld [vmem:[#allocation2 + $0xf0] sm:$0xff]  ;;  %v54_v31 = vld [vmem:[#allocation2 + $0xf8] sm:$0xff] }
  0x10   :  { %60 = vst [vmem:[#allocation5 + $0x28] sm:$0xff] %v28_v5 }
  0x11   :  { %92 = vst [vmem:[#allocation5 + $0x128] sm:$0xff] %v28_v5 }
  0x12   :  { %61 = vst [vmem:[#allocation5 + $0x30] sm:$0xff] %v29_v6 }
  0x13   :  { %93 = vst [vmem:[#allocation5 + $0x130] sm:$0xff] %v29_v6 }
  0x14   :  { %62 = vst [vmem:[#allocation5 + $0x38] sm:$0xff] %v30_v7 }
  0x15   :  { %94 = vst [vmem:[#allocation5 + $0x138] sm:$0xff] %v30_v7 }
  0x16   :  { %63 = vst [vmem:[#allocation5 + $0x40] sm:$0xff] %v31_v8 }
  0x17   :  { %95 = vst [vmem:[#allocation5 + $0x140] sm:$0xff] %v31_v8 }
  0x18   :  { %64 = vst [vmem:[#allocation5 + $0x48] sm:$0xff] %v32_v9 }
  0x19   :  { %96 = vst [vmem:[#allocation5 + $0x148] sm:$0xff] %v32_v9 }
  0x1a   :  { %65 = vst [vmem:[#allocation5 + $0x50] sm:$0xff] %v33_v10 }
  0x1b   :  { %97 = vst [vmem:[#allocation5 + $0x150] sm:$0xff] %v33_v10 }
  0x1c   :  { %66 = vst [vmem:[#allocation5 + $0x58] sm:$0xff] %v34_v11 }
  0x1d   :  { %98 = vst [vmem:[#allocation5 + $0x158] sm:$0xff] %v34_v11 }
  0x1e   :  { %67 = vst [vmem:[#allocation5 + $0x60] sm:$0xff] %v35_v12 }
  0x1f   :  { %99 = vst [vmem:[#allocation5 + $0x160] sm:$0xff] %v35_v12 }
  0x20   :  { %68 = vst [vmem:[#allocation5 + $0x68] sm:$0xff] %v36_v13 }
  0x21   :  { %100 = vst [vmem:[#allocation5 + $0x168] sm:$0xff] %v36_v13 }
  0x22   :  { %69 = vst [vmem:[#allocation5 + $0x70] sm:$0xff] %v37_v14 }
  0x23   :  { %101 = vst [vmem:[#allocation5 + $0x170] sm:$0xff] %v37_v14 }
  0x24   :  { %70 = vst [vmem:[#allocation5 + $0x78] sm:$0xff] %v38_v15 }
  0x25   :  { %102 = vst [vmem:[#allocation5 + $0x178] sm:$0xff] %v38_v15 }
  0x26   :  { %71 = vst [vmem:[#allocation5 + $0x80] sm:$0xff] %v39_v16 }
  0x27   :  { %103 = vst [vmem:[#allocation5 + $0x180] sm:$0xff] %v39_v16 }
  0x28   :  { %72 = vst [vmem:[#allocation5 + $0x88] sm:$0xff] %v40_v17 }
  0x29   :  { %104 = vst [vmem:[#allocation5 + $0x188] sm:$0xff] %v40_v17 }
  0x2a   :  { %73 = vst [vmem:[#allocation5 + $0x90] sm:$0xff] %v41_v18 }
  0x2b   :  { %105 = vst [vmem:[#allocation5 + $0x190] sm:$0xff] %v41_v18 }
  0x2c   :  { %74 = vst [vmem:[#allocation5 + $0x98] sm:$0xff] %v42_v19 }
  0x2d   :  { %106 = vst [vmem:[#allocation5 + $0x198] sm:$0xff] %v42_v19 }
  0x2e   :  { %75 = vst [vmem:[#allocation5 + $0xa0] sm:$0xff] %v43_v20 }
  0x2f   :  { %107 = vst [vmem:[#allocation5 + $0x1a0] sm:$0xff] %v43_v20 }
  0x30   :  { %76 = vst [vmem:[#allocation5 + $0xa8] sm:$0xff] %v44_v21 }
  0x31   :  { %108 = vst [vmem:[#allocation5 + $0x1a8] sm:$0xff] %v44_v21 }
  0x32   :  { %77 = vst [vmem:[#allocation5 + $0xb0] sm:$0xff] %v45_v22 }
  0x33   :  { %109 = vst [vmem:[#allocation5 + $0x1b0] sm:$0xff] %v45_v22 }
  0x34   :  { %78 = vst [vmem:[#allocation5 + $0xb8] sm:$0xff] %v46_v23 }
  0x35   :  { %110 = vst [vmem:[#allocation5 + $0x1b8] sm:$0xff] %v46_v23 }
  0x36   :  { %79 = vst [vmem:[#allocation5 + $0xc0] sm:$0xff] %v47_v24 }
  0x37   :  { %111 = vst [vmem:[#allocation5 + $0x1c0] sm:$0xff] %v47_v24 }
  0x38   :  { %80 = vst [vmem:[#allocation5 + $0xc8] sm:$0xff] %v48_v25 }
  0x39   :  { %112 = vst [vmem:[#allocation5 + $0x1c8] sm:$0xff] %v48_v25 }
  0x3a   :  { %81 = vst [vmem:[#allocation5 + $0xd0] sm:$0xff] %v49_v26 }
  0x3b   :  { %113 = vst [vmem:[#allocation5 + $0x1d0] sm:$0xff] %v49_v26 }
  0x3c   :  { %82 = vst [vmem:[#allocation5 + $0xd8] sm:$0xff] %v50_v27 }
  0x3d   :  { %114 = vst [vmem:[#allocation5 + $0x1d8] sm:$0xff] %v50_v27 }
  0x3e   :  { %83 = vst [vmem:[#allocation5 + $0xe0] sm:$0xff] %v51_v28 }
  0x3f   :  { %115 = vst [vmem:[#allocation5 + $0x1e0] sm:$0xff] %v51_v28 }
  0x40   :  { %84 = vst [vmem:[#allocation5 + $0xe8] sm:$0xff] %v52_v29 }
  0x41   :  { %116 = vst [vmem:[#allocation5 + $0x1e8] sm:$0xff] %v52_v29 }
  0x42   :  { %85 = vst [vmem:[#allocation5 + $0xf0] sm:$0xff] %v53_v30 }
  0x43   :  { %117 = vst [vmem:[#allocation5 + $0x1f0] sm:$0xff] %v53_v30 }
  0x44   :  { %86 = vst [vmem:[#allocation5 + $0xf8] sm:$0xff] %v54_v31 }
  0x45   :  { %118 = vst [vmem:[#allocation5 + $0x1f8] sm:$0xff] %v54_v31 }
  0x46   :  { %131 = dma.vmem_to_hbm [thread:$0]  %s124_s11, 8192, %s126_s14, [#allocation4], %s196_s15, %s196_s15, %s197_s16  }
  0x47   :  { %192 = dma.done.wait [#allocation4], 8192  }
  0x48   :  { %193 = vsyncadd [#allocation4], 4294959104 }
  0x49   :  { %136 = vsyncpa [#allocation3], 1 }
  0x4a   :  { %137 = vsyncpa [#allocation4], 1 }

</bundles_post_ra>
